<compile_context>
chip_gen: v6e
topology: v6e:2x2x1
jax: 0.10.0
libtpu: 0.0.40
codegen_flags: <defaults>
</compile_context>

<pallas_src>
import math
from functools import partial

import jax
import jax.numpy as jnp
from jax.experimental import pallas as pl
from jax.experimental.pallas import tpu as pltpu


def _round_up(x, m):
    return (x + m - 1) // m * m


def _choose_tile_m(batch, max_tile_m=1024):
    """Adaptive batch tile.

    * small batches: one minimal 16-row tile (bf16 sublane pack) -> no wasted work
    * large batches: big tiles (amortize ~0.35us/step pipeline overhead), but keep
      at least 2 grid steps so dimension_semantics=("parallel",) can use both
      TensorCores on v7x
    * tiles above 128 rows snap to a multiple of 128 (full MXU LHS passes on v5e)
    """
    MIN_TILE = 16
    if batch <= MIN_TILE:
        return MIN_TILE
    target = _round_up(pl.cdiv(batch, 2), MIN_TILE)   # ~half the batch per step
    t = min(max_tile_m, target)
    if t > 128:
        t = max(128, (t // 128) * 128)
    return t


# ----------------------------- Pallas kernel ------------------------------
def ae_kernel(
    x_ref,
    w1_ref, b1_ref,
    w2_ref, b2_ref,
    w3_ref, b3_ref,
    w4_ref, b4_ref,
    w5_ref, b5_ref,
    w6_ref, b6_ref,
    recon_ref, z_ref,
):
    # x tile: (TILE_M, x_dim) bf16. Weights bf16 (in, out) layout (pre-padded,
    # lane-dense), biases f32 (1, out).
    x = x_ref[...]

    # ---- encoder ----
    h = jnp.dot(x, w1_ref[...], preferred_element_type=jnp.float32) + b1_ref[...]
    h = jnp.maximum(h, 0.0)
    h = jnp.dot(h.astype(jnp.bfloat16), w2_ref[...],
                preferred_element_type=jnp.float32) + b2_ref[...]
    h = jnp.maximum(h, 0.0)
    z = jnp.dot(h.astype(jnp.bfloat16), w3_ref[...],
                preferred_element_type=jnp.float32) + b3_ref[...]
    z_ref[...] = z.astype(z_ref.dtype)          # lane-dense bf16 (TILE_M, z_pad) store

    # ---- decoder ----
    h = jnp.dot(z.astype(jnp.bfloat16), w4_ref[...],
                preferred_element_type=jnp.float32) + b4_ref[...]
    h = jnp.maximum(h, 0.0)
    h = jnp.dot(h.astype(jnp.bfloat16), w5_ref[...],
                preferred_element_type=jnp.float32) + b5_ref[...]
    h = jnp.maximum(h, 0.0)
    logits = jnp.dot(h.astype(jnp.bfloat16), w6_ref[...],
                     preferred_element_type=jnp.float32) + b6_ref[...]
    recon_ref[...] = jax.nn.sigmoid(logits).astype(recon_ref.dtype)


# ----------------------- one-time weight preparation ------------------------
def prepare_params(params):
    """Hoisted out of the forward path (runs once): cast weights to bf16 and
    zero-pad every hidden/latent dim to a multiple of 128 (lane-dense).

    Exact: padded output columns and padded bias entries are zero, ReLU(0)=0,
    and the matching (zero) input rows of the next layer contribute nothing.
    """
    w1, b1 = params["w1"], params["b1"]
    w2, b2 = params["w2"], params["b2"]
    w3, b3 = params["w3"], params["b3"]
    w4, b4 = params["w4"], params["b4"]
    w5, b5 = params["w5"], params["b5"]
    w6, b6 = params["w6"], params["b6"]

    x_dim, h1 = w1.shape
    h2 = w2.shape[1]
    zd = w3.shape[1]
    h1p, h2p, zp = (_round_up(d, 128) for d in (h1, h2, zd))

    def padw(w, rows, cols):
        out = jnp.zeros((rows, cols), jnp.float32)
        return out.at[: w.shape[0], : w.shape[1]].set(w)

    def padb(b, cols):
        b = jnp.asarray(b, jnp.float32).reshape(1, -1)
        out = jnp.zeros((1, cols), jnp.float32)
        return out.at[:, : b.shape[1]].set(b)

    bf = lambda a: a.astype(jnp.bfloat16)

    prepared = (
        bf(padw(w1, x_dim, h1p)), padb(b1, h1p),
        bf(padw(w2, h1p, h2p)),   padb(b2, h2p),
        bf(padw(w3, h2p, zp)),    padb(b3, zp),
        bf(padw(w4, zp, h2p)),    padb(b4, h2p),
        bf(padw(w5, h2p, h1p)),   padb(b5, h1p),
        bf(padw(w6, h1p, x_dim)), padb(b6, x_dim),
    )
    return jax.device_put(prepared)


# ------------------------------ wrapper -----------------------------------
@partial(jax.jit, static_argnames=("z_dim", "max_tile_m"))
def ae_forward(x, prepared, z_dim, max_tile_m=1024):
    """Mimics AE.forward: returns (decoder(z), z) with x flattened to (-1, x_dim).

    `prepared` must come from prepare_params(). Outputs are bf16.
    """
    x_dim = prepared[0].shape[0]
    h1p = prepared[0].shape[1]
    h2p = prepared[2].shape[1]
    z_pad = prepared[4].shape[1]

    x2d = x.reshape(-1, x_dim)
    batch = x2d.shape[0]

    tile_m = _choose_tile_m(batch, max_tile_m)
    padded_batch = _round_up(max(batch, 1), tile_m)

    # Cast to bf16 (halves input HBM traffic); pad rows only when needed.
    x_bf16 = x2d.astype(jnp.bfloat16)
    if padded_batch != batch:
        x_bf16 = jnp.pad(x_bf16, ((0, padded_batch - batch), (0, 0)))

    grid = (padded_batch // tile_m,)

    # Weights/biases: full-array blocks, grid-invariant index_map -> VMEM-resident.
    # (pipeline_mode=pl.Buffered(1) would save one duplicate buffer per weight
    #  (~0.2 MB total at these dims); skipped as not needed for VMEM fit.)
    def full_spec(arr):
        return pl.BlockSpec(arr.shape, lambda i: (0, 0))

    in_specs = [pl.BlockSpec((tile_m, x_dim), lambda i: (i, 0))]
    in_specs += [full_spec(w) for w in prepared]

    flops = 2 * padded_batch * (
        x_dim * h1p + h1p * h2p + h2p * z_pad
        + z_pad * h2p + h2p * h1p + h1p * x_dim
    )
    bytes_accessed = (
        padded_batch * x_dim * 2                               # x (bf16)
        + sum(int(w.size) * w.dtype.itemsize for w in prepared)
        + padded_batch * x_dim * 2                             # recon (bf16)
        + padded_batch * z_pad * 2                             # z slab (bf16)
    )

    recon, z_padded = pl.pallas_call(
        ae_kernel,
        out_shape=(
            jax.ShapeDtypeStruct((padded_batch, x_dim), jnp.bfloat16),
            jax.ShapeDtypeStruct((padded_batch, z_pad), jnp.bfloat16),
        ),
        grid_spec=pltpu.PrefetchScalarGridSpec(
            num_scalar_prefetch=0,
            grid=grid,
            in_specs=in_specs,
            out_specs=(
                pl.BlockSpec((tile_m, x_dim), lambda i: (i, 0)),
                pl.BlockSpec((tile_m, z_pad), lambda i: (i, 0)),
            ),
        ),
        compiler_params=pltpu.CompilerParams(
            dimension_semantics=("parallel",),   # megacore sharding on v7x
        ),
        cost_estimate=pl.CostEstimate(
            flops=flops,
            transcendentals=padded_batch * x_dim,              # sigmoid exp
            bytes_accessed=bytes_accessed,
        ),
    )(x_bf16, *prepared)

    if padded_batch != batch:
        recon = recon[:batch]
    return recon, z_padded[:batch, :z_dim]


# ------------------------- parameter construction -------------------------
def init_linear(key, in_dim, out_dim):
    """PyTorch nn.Linear default init: U(-1/sqrt(in), 1/sqrt(in)).

    Weights stored transposed, shape (in_dim, out_dim), so y = x @ W + b.
    Biases kept 2-D (1, out_dim) for TPU layout.
    """
    kw, kb = jax.random.split(key)
    bound = 1.0 / math.sqrt(in_dim)
    w = jax.random.uniform(kw, (in_dim, out_dim), jnp.float32, -bound, bound)
    b = jax.random.uniform(kb, (1, out_dim), jnp.float32, -bound, bound)
    return w, b


def make_params(key, x_dim, h_dim1, h_dim2, z_dim):
    keys = jax.random.split(key, 6)
    w1, b1 = init_linear(keys[0], x_dim, h_dim1)
    w2, b2 = init_linear(keys[1], h_dim1, h_dim2)
    w3, b3 = init_linear(keys[2], h_dim2, z_dim)
    w4, b4 = init_linear(keys[3], z_dim, h_dim2)
    w5, b5 = init_linear(keys[4], h_dim2, h_dim1)
    w6, b6 = init_linear(keys[5], h_dim1, x_dim)
    return dict(
        w1=w1, b1=b1, w2=w2, b2=b2, w3=w3, b3=b3,
        w4=w4, b4=b4, w5=w5, b5=b5, w6=w6, b6=b6,
    )


# ---------------------------- JAX references --------------------------------
def ae_reference_f32(x, params, x_dim):
    h = x.reshape(-1, x_dim).astype(jnp.float32)
    h1 = jax.nn.relu(h @ params["w1"] + params["b1"])
    h2 = jax.nn.relu(h1 @ params["w2"] + params["b2"])
    z = h2 @ params["w3"] + params["b3"]
    d1 = jax.nn.relu(z @ params["w4"] + params["b4"])
    d2 = jax.nn.relu(d1 @ params["w5"] + params["b5"])
    recon = jax.nn.sigmoid(d2 @ params["w6"] + params["b6"])
    return recon, z


def ae_reference_bf16(x, params, x_dim):
    """Matches the kernel's precision: bf16 dot operands, f32 accumulation/elementwise."""
    bf = lambda a: a.astype(jnp.bfloat16)
    dot = lambda a, w: jnp.dot(bf(a), bf(w), preferred_element_type=jnp.float32)
    h = x.reshape(-1, x_dim)
    h = jnp.maximum(dot(h, params["w1"]) + params["b1"], 0.0)
    h = jnp.maximum(dot(h, params["w2"]) + params["b2"], 0.0)
    z = dot(h, params["w3"]) + params["b3"]
    h = jnp.maximum(dot(z, params["w4"]) + params["b4"], 0.0)
    h = jnp.maximum(dot(h, params["w5"]) + params["b5"], 0.0)
    recon = jax.nn.sigmoid(dot(h, params["w6"]) + params["b6"])
    return recon, z


# ------------------------------- main --------------------------------------
if __name__ == "__main__":
    # Model dims (MLP autoencoder on flattened features)
    x_dim, h_dim1, h_dim2, z_dim = 256, 128, 64, 32

    key = jax.random.PRNGKey(0)
    k_params, k_x = jax.random.split(key)

    params = make_params(k_params, x_dim, h_dim1, h_dim2, z_dim)
    prepared = prepare_params(params)        # one-time bf16 cast + lane-dense padding

    # NCHW input like the PyTorch module would receive: (2, 4, 16, 16)
    # -> x.view(-1, 256) gives an effective batch of 8 rows.
    x = jax.random.normal(k_x, (2, 4, 16, 16), dtype=jnp.float32)

    recon, z = ae_forward(x, prepared, z_dim=z_dim)
    jax.block_until_ready((recon, z))

    assert recon.shape == (8, x_dim) and z.shape == (8, z_dim)
    assert recon.dtype == jnp.bfloat16 and z.dtype == jnp.bfloat16

    # Check against a precision-matched (bf16-dot) reference; outputs are bf16
    # so allow the bf16 output-rounding on top of it.
    recon_bf, z_bf = ae_reference_bf16(x, params, x_dim)
    assert jnp.allclose(recon.astype(jnp.float32), recon_bf, atol=2e-2, rtol=2e-2)
    assert jnp.allclose(z.astype(jnp.float32), z_bf, atol=2e-2, rtol=2e-2)

    # Loose sanity check against the full-f32 reference.
    recon_f32, z_f32 = ae_reference_f32(x, params, x_dim)
    assert jnp.allclose(recon.astype(jnp.float32), recon_f32, atol=0.1, rtol=0.1)
    assert jnp.allclose(z.astype(jnp.float32), z_f32, atol=0.1, rtol=0.1)

    print("KERNEL_OK")
</pallas_src>

<mosaic_0001>
module attributes {stable_mosaic.version = 11 : i64} {
  func.func @ae_kernel(%arg0: i32, %arg1: memref<16x256xbf16, #tpu.memory_space<vmem>>, %arg2: memref<256x128xbf16, #tpu.memory_space<vmem>>, %arg3: memref<1x128xf32, #tpu.memory_space<vmem>>, %arg4: memref<128x128xbf16, #tpu.memory_space<vmem>>, %arg5: memref<1x128xf32, #tpu.memory_space<vmem>>, %arg6: memref<128x128xbf16, #tpu.memory_space<vmem>>, %arg7: memref<1x128xf32, #tpu.memory_space<vmem>>, %arg8: memref<128x128xbf16, #tpu.memory_space<vmem>>, %arg9: memref<1x128xf32, #tpu.memory_space<vmem>>, %arg10: memref<128x128xbf16, #tpu.memory_space<vmem>>, %arg11: memref<1x128xf32, #tpu.memory_space<vmem>>, %arg12: memref<128x256xbf16, #tpu.memory_space<vmem>>, %arg13: memref<1x256xf32, #tpu.memory_space<vmem>>, %arg14: memref<16x256xbf16, #tpu.memory_space<vmem>>, %arg15: memref<16x128xbf16, #tpu.memory_space<vmem>>) attributes {dimension_semantics = [#tpu.dimension_semantics<parallel>], iteration_bounds = array<i64: 1>, scalar_prefetch = 0 : i64, scratch_operands = 0 : i64, tpu.core_type = #tpu.core_type<tc>, window_params = [{transform_indices = @transform_0, window_bounds = array<i64: 16, 256>}, {pipeline_mode = #tpu.pipeline_mode<synchronous>, transform_indices = @transform_1, window_bounds = array<i64: 256, 128>}, {pipeline_mode = #tpu.pipeline_mode<synchronous>, transform_indices = @transform_2, window_bounds = array<i64: 1, 128>}, {pipeline_mode = #tpu.pipeline_mode<synchronous>, transform_indices = @transform_3, window_bounds = array<i64: 128, 128>}, {pipeline_mode = #tpu.pipeline_mode<synchronous>, transform_indices = @transform_4, window_bounds = array<i64: 1, 128>}, {pipeline_mode = #tpu.pipeline_mode<synchronous>, transform_indices = @transform_5, window_bounds = array<i64: 128, 128>}, {pipeline_mode = #tpu.pipeline_mode<synchronous>, transform_indices = @transform_6, window_bounds = array<i64: 1, 128>}, {pipeline_mode = #tpu.pipeline_mode<synchronous>, transform_indices = @transform_7, window_bounds = array<i64: 128, 128>}, {pipeline_mode = #tpu.pipeline_mode<synchronous>, transform_indices = @transform_8, window_bounds = array<i64: 1, 128>}, {pipeline_mode = #tpu.pipeline_mode<synchronous>, transform_indices = @transform_9, window_bounds = array<i64: 128, 128>}, {pipeline_mode = #tpu.pipeline_mode<synchronous>, transform_indices = @transform_10, window_bounds = array<i64: 1, 128>}, {pipeline_mode = #tpu.pipeline_mode<synchronous>, transform_indices = @transform_11, window_bounds = array<i64: 128, 256>}, {pipeline_mode = #tpu.pipeline_mode<synchronous>, transform_indices = @transform_12, window_bounds = array<i64: 1, 256>}, {transform_indices = @transform_13, window_bounds = array<i64: 16, 256>}, {transform_indices = @transform_14, window_bounds = array<i64: 16, 128>}]} {
    %c0 = arith.constant 0 : index
    %c0_0 = arith.constant 0 : index
    %0 = vector.load %arg1[%c0, %c0_0] : memref<16x256xbf16, #tpu.memory_space<vmem>>, vector<16x256xbf16>
    %c0_1 = arith.constant 0 : index
    %c0_2 = arith.constant 0 : index
    %1 = vector.load %arg2[%c0_1, %c0_2] : memref<256x128xbf16, #tpu.memory_space<vmem>>, vector<256x128xbf16>
    %cst = arith.constant dense<0.000000e+00> : vector<16x128xf32>
    %2 = tpu.matmul %0, %1, %cst {dimension_numbers = #tpu.dot_dimension_numbers<[1], [0], [0], [1], [0, 0, 1, 1], [], []>} : vector<16x256xbf16>, vector<256x128xbf16>, vector<16x128xf32> -> vector<16x128xf32>
    %c0_3 = arith.constant 0 : index
    %c0_4 = arith.constant 0 : index
    %3 = vector.load %arg3[%c0_3, %c0_4] : memref<1x128xf32, #tpu.memory_space<vmem>>, vector<1x128xf32>
    %4 = vector.broadcast %3 : vector<1x128xf32> to vector<16x128xf32>
    %5 = arith.addf %2, %4 : vector<16x128xf32>
    %cst_5 = arith.constant 0.000000e+00 : f32
    %6 = vector.broadcast %cst_5 : f32 to vector<16x128xf32>
    %7 = arith.maximumf %5, %6 : vector<16x128xf32>
    %8 = arith.truncf %7 : vector<16x128xf32> to vector<16x128xbf16>
    %c0_6 = arith.constant 0 : index
    %c0_7 = arith.constant 0 : index
    %9 = vector.load %arg4[%c0_6, %c0_7] : memref<128x128xbf16, #tpu.memory_space<vmem>>, vector<128x128xbf16>
    %cst_8 = arith.constant dense<0.000000e+00> : vector<16x128xf32>
    %10 = tpu.matmul %8, %9, %cst_8 {dimension_numbers = #tpu.dot_dimension_numbers<[1], [0], [0], [1], [0, 0, 1, 1], [], []>} : vector<16x128xbf16>, vector<128x128xbf16>, vector<16x128xf32> -> vector<16x128xf32>
    %c0_9 = arith.constant 0 : index
    %c0_10 = arith.constant 0 : index
    %11 = vector.load %arg5[%c0_9, %c0_10] : memref<1x128xf32, #tpu.memory_space<vmem>>, vector<1x128xf32>
    %12 = vector.broadcast %11 : vector<1x128xf32> to vector<16x128xf32>
    %13 = arith.addf %10, %12 : vector<16x128xf32>
    %cst_11 = arith.constant 0.000000e+00 : f32
    %14 = vector.broadcast %cst_11 : f32 to vector<16x128xf32>
    %15 = arith.maximumf %13, %14 : vector<16x128xf32>
    %16 = arith.truncf %15 : vector<16x128xf32> to vector<16x128xbf16>
    %c0_12 = arith.constant 0 : index
    %c0_13 = arith.constant 0 : index
    %17 = vector.load %arg6[%c0_12, %c0_13] : memref<128x128xbf16, #tpu.memory_space<vmem>>, vector<128x128xbf16>
    %cst_14 = arith.constant dense<0.000000e+00> : vector<16x128xf32>
    %18 = tpu.matmul %16, %17, %cst_14 {dimension_numbers = #tpu.dot_dimension_numbers<[1], [0], [0], [1], [0, 0, 1, 1], [], []>} : vector<16x128xbf16>, vector<128x128xbf16>, vector<16x128xf32> -> vector<16x128xf32>
    %c0_15 = arith.constant 0 : index
    %c0_16 = arith.constant 0 : index
    %19 = vector.load %arg7[%c0_15, %c0_16] : memref<1x128xf32, #tpu.memory_space<vmem>>, vector<1x128xf32>
    %20 = vector.broadcast %19 : vector<1x128xf32> to vector<16x128xf32>
    %21 = arith.addf %18, %20 : vector<16x128xf32>
    %22 = arith.truncf %21 : vector<16x128xf32> to vector<16x128xbf16>
    %c0_17 = arith.constant 0 : index
    %c0_18 = arith.constant 0 : index
    %23 = vector.load %arg15[%c0_17, %c0_18] : memref<16x128xbf16, #tpu.memory_space<vmem>>, vector<16x128xbf16>
    tpu.vector_store %arg15[%c0_17, %c0_18], %22 {strides = array<i32>} : memref<16x128xbf16, #tpu.memory_space<vmem>>, vector<16x128xbf16>,
    %24 = arith.truncf %21 : vector<16x128xf32> to vector<16x128xbf16>
    %c0_19 = arith.constant 0 : index
    %c0_20 = arith.constant 0 : index
    %25 = vector.load %arg8[%c0_19, %c0_20] : memref<128x128xbf16, #tpu.memory_space<vmem>>, vector<128x128xbf16>
    %cst_21 = arith.constant dense<0.000000e+00> : vector<16x128xf32>
    %26 = tpu.matmul %24, %25, %cst_21 {dimension_numbers = #tpu.dot_dimension_numbers<[1], [0], [0], [1], [0, 0, 1, 1], [], []>} : vector<16x128xbf16>, vector<128x128xbf16>, vector<16x128xf32> -> vector<16x128xf32>
    %c0_22 = arith.constant 0 : index
    %c0_23 = arith.constant 0 : index
    %27 = vector.load %arg9[%c0_22, %c0_23] : memref<1x128xf32, #tpu.memory_space<vmem>>, vector<1x128xf32>
    %28 = vector.broadcast %27 : vector<1x128xf32> to vector<16x128xf32>
    %29 = arith.addf %26, %28 : vector<16x128xf32>
    %cst_24 = arith.constant 0.000000e+00 : f32
    %30 = vector.broadcast %cst_24 : f32 to vector<16x128xf32>
    %31 = arith.maximumf %29, %30 : vector<16x128xf32>
    %32 = arith.truncf %31 : vector<16x128xf32> to vector<16x128xbf16>
    %c0_25 = arith.constant 0 : index
    %c0_26 = arith.constant 0 : index
    %33 = vector.load %arg10[%c0_25, %c0_26] : memref<128x128xbf16, #tpu.memory_space<vmem>>, vector<128x128xbf16>
    %cst_27 = arith.constant dense<0.000000e+00> : vector<16x128xf32>
    %34 = tpu.matmul %32, %33, %cst_27 {dimension_numbers = #tpu.dot_dimension_numbers<[1], [0], [0], [1], [0, 0, 1, 1], [], []>} : vector<16x128xbf16>, vector<128x128xbf16>, vector<16x128xf32> -> vector<16x128xf32>
    %c0_28 = arith.constant 0 : index
    %c0_29 = arith.constant 0 : index
    %35 = vector.load %arg11[%c0_28, %c0_29] : memref<1x128xf32, #tpu.memory_space<vmem>>, vector<1x128xf32>
    %36 = vector.broadcast %35 : vector<1x128xf32> to vector<16x128xf32>
    %37 = arith.addf %34, %36 : vector<16x128xf32>
    %cst_30 = arith.constant 0.000000e+00 : f32
    %38 = vector.broadcast %cst_30 : f32 to vector<16x128xf32>
    %39 = arith.maximumf %37, %38 : vector<16x128xf32>
    %40 = arith.truncf %39 : vector<16x128xf32> to vector<16x128xbf16>
    %c0_31 = arith.constant 0 : index
    %c0_32 = arith.constant 0 : index
    %41 = vector.load %arg12[%c0_31, %c0_32] : memref<128x256xbf16, #tpu.memory_space<vmem>>, vector<128x256xbf16>
    %cst_33 = arith.constant dense<0.000000e+00> : vector<16x256xf32>
    %42 = tpu.matmul %40, %41, %cst_33 {dimension_numbers = #tpu.dot_dimension_numbers<[1], [0], [0], [1], [0, 0, 1, 1], [], []>} : vector<16x128xbf16>, vector<128x256xbf16>, vector<16x256xf32> -> vector<16x256xf32>
    %c0_34 = arith.constant 0 : index
    %c0_35 = arith.constant 0 : index
    %43 = vector.load %arg13[%c0_34, %c0_35] : memref<1x256xf32, #tpu.memory_space<vmem>>, vector<1x256xf32>
    %44 = vector.broadcast %43 : vector<1x256xf32> to vector<16x256xf32>
    %45 = arith.addf %42, %44 : vector<16x256xf32>
    %46 = arith.negf %45 : vector<16x256xf32>
    %47 = math.exp %46 : vector<16x256xf32>
    %cst_36 = arith.constant 1.000000e+00 : f32
    %48 = vector.broadcast %cst_36 : f32 to vector<16x256xf32>
    %49 = arith.addf %48, %47 : vector<16x256xf32>
    %50 = arith.divf %48, %49 : vector<16x256xf32>
    %51 = arith.truncf %50 : vector<16x256xf32> to vector<16x256xbf16>
    %c0_37 = arith.constant 0 : index
    %c0_38 = arith.constant 0 : index
    %52 = vector.load %arg14[%c0_37, %c0_38] : memref<16x256xbf16, #tpu.memory_space<vmem>>, vector<16x256xbf16>
    tpu.vector_store %arg14[%c0_37, %c0_38], %51 {strides = array<i32>} : memref<16x256xbf16, #tpu.memory_space<vmem>>, vector<16x256xbf16>,
    return
  }
  func.func @transform_0(%arg0: i32) -> (i32, i32) {
    %c0_i32 = arith.constant 0 : i32
    %c0_i32_0 = arith.constant 0 : i32
    return %arg0, %c0_i32 : i32, i32
  }
  func.func @transform_1(%arg0: i32) -> (i32, i32) {
    %c0_i32 = arith.constant 0 : i32
    %c0_i32_0 = arith.constant 0 : i32
    %c0_i32_1 = arith.constant 0 : i32
    return %c0_i32, %c0_i32_0 : i32, i32
  }
  func.func @transform_2(%arg0: i32) -> (i32, i32) {
    %c0_i32 = arith.constant 0 : i32
    %c0_i32_0 = arith.constant 0 : i32
    %c0_i32_1 = arith.constant 0 : i32
    return %c0_i32, %c0_i32_0 : i32, i32
  }
  func.func @transform_3(%arg0: i32) -> (i32, i32) {
    %c0_i32 = arith.constant 0 : i32
    %c0_i32_0 = arith.constant 0 : i32
    %c0_i32_1 = arith.constant 0 : i32
    return %c0_i32, %c0_i32_0 : i32, i32
  }
  func.func @transform_4(%arg0: i32) -> (i32, i32) {
    %c0_i32 = arith.constant 0 : i32
    %c0_i32_0 = arith.constant 0 : i32
    %c0_i32_1 = arith.constant 0 : i32
    return %c0_i32, %c0_i32_0 : i32, i32
  }
  func.func @transform_5(%arg0: i32) -> (i32, i32) {
    %c0_i32 = arith.constant 0 : i32
    %c0_i32_0 = arith.constant 0 : i32
    %c0_i32_1 = arith.constant 0 : i32
    return %c0_i32, %c0_i32_0 : i32, i32
  }
  func.func @transform_6(%arg0: i32) -> (i32, i32) {
    %c0_i32 = arith.constant 0 : i32
    %c0_i32_0 = arith.constant 0 : i32
    %c0_i32_1 = arith.constant 0 : i32
    return %c0_i32, %c0_i32_0 : i32, i32
  }
  func.func @transform_7(%arg0: i32) -> (i32, i32) {
    %c0_i32 = arith.constant 0 : i32
    %c0_i32_0 = arith.constant 0 : i32
    %c0_i32_1 = arith.constant 0 : i32
    return %c0_i32, %c0_i32_0 : i32, i32
  }
  func.func @transform_8(%arg0: i32) -> (i32, i32) {
    %c0_i32 = arith.constant 0 : i32
    %c0_i32_0 = arith.constant 0 : i32
    %c0_i32_1 = arith.constant 0 : i32
    return %c0_i32, %c0_i32_0 : i32, i32
  }
  func.func @transform_9(%arg0: i32) -> (i32, i32) {
    %c0_i32 = arith.constant 0 : i32
    %c0_i32_0 = arith.constant 0 : i32
    %c0_i32_1 = arith.constant 0 : i32
    return %c0_i32, %c0_i32_0 : i32, i32
  }
  func.func @transform_10(%arg0: i32) -> (i32, i32) {
    %c0_i32 = arith.constant 0 : i32
    %c0_i32_0 = arith.constant 0 : i32
    %c0_i32_1 = arith.constant 0 : i32
    return %c0_i32, %c0_i32_0 : i32, i32
  }
  func.func @transform_11(%arg0: i32) -> (i32, i32) {
    %c0_i32 = arith.constant 0 : i32
    %c0_i32_0 = arith.constant 0 : i32
    %c0_i32_1 = arith.constant 0 : i32
    return %c0_i32, %c0_i32_0 : i32, i32
  }
  func.func @transform_12(%arg0: i32) -> (i32, i32) {
    %c0_i32 = arith.constant 0 : i32
    %c0_i32_0 = arith.constant 0 : i32
    %c0_i32_1 = arith.constant 0 : i32
    return %c0_i32, %c0_i32_0 : i32, i32
  }
  func.func @transform_13(%arg0: i32) -> (i32, i32) {
    %c0_i32 = arith.constant 0 : i32
    %c0_i32_0 = arith.constant 0 : i32
    return %arg0, %c0_i32 : i32, i32
  }
  func.func @transform_14(%arg0: i32) -> (i32, i32) {
    %c0_i32 = arith.constant 0 : i32
    %c0_i32_0 = arith.constant 0 : i32
    return %arg0, %c0_i32 : i32, i32
  }
}

</mosaic_0001>

<bundles_post_ra>
// kernel: ae_forward.1
= control target key start
LH: loop header
LB: loop body
LE: loop exit
PB: predicated region body
PF: predicated region fallthrough
CT: control target
= control target key end

     0   :  { %20 = vsyncpa [#allocation3], 0  ;;  %s1649_s0 = inlined_call_operand.vmem [shape: bf16[16,256], index: 0, kind: input, shape index: {}]   ;;  %s1650_s1 = inlined_call_operand.vmem [shape: bf16[256,128], index: 1, kind: input, shape index: {}]   ;;  %s1651_s2 = inlined_call_operand.vmem [shape: f32[1,128], index: 2, kind: input, shape index: {}]   ;;  %s1652_s3 = inlined_call_operand.hbm [shape: bf16[128,128], index: 3, kind: input, shape index: {}]   ;;  %s1653_s4 = inlined_call_operand.vmem [shape: f32[1,128], index: 4, kind: input, shape index: {}]   ;;  %s1654_s5 = inlined_call_operand.hbm [shape: bf16[128,128], index: 5, kind: input, shape index: {}]   ;;  %s1655_s6 = inlined_call_operand.vmem [shape: f32[1,128], index: 6, kind: input, shape index: {}]   ;;  %s1656_s7 = inlined_call_operand.hbm [shape: bf16[128,128], index: 7, kind: input, shape index: {}]   ;;  %s1657_s8 = inlined_call_operand.vmem [shape: f32[1,128], index: 8, kind: input, shape index: {}]   ;;  %s1658_s9 = inlined_call_operand.hbm [shape: bf16[128,128], index: 9, kind: input, shape index: {}]   ;;  %s1659_s10 = inlined_call_operand.vmem [shape: f32[1,128], index: 10, kind: input, shape index: {}]   ;;  %s1660_s11 = inlined_call_operand.vmem [shape: bf16[128,256], index: 11, kind: input, shape index: {}]   ;;  %s1661_s12 = inlined_call_operand.vmem [shape: f32[1,256], index: 12, kind: input, shape index: {}]   ;;  %s1662_s13 = inlined_call_operand.vmem [shape: bf16[16,256], index: 13, kind: output, shape index: {0}]   ;;  %s1663_s14 = inlined_call_operand.vmem [shape: bf16[16,128], index: 14, kind: output, shape index: {1}]  }
   0x1   :  { %21 = vsyncpa [#allocation5], 0 }
   0x2   :  { %22 = vsyncpa [#allocation8], 0  ;;  %s1372_s29 = smov [#allocation4]   ;;  %s1373_s15 = smov [#allocation2]  }
   0x3   :  { %s48_s30 = sshll.u32 %s1372_s29, 4  ;;  %s34_s16 = sshll.u32 %s1373_s15, 4  ;;  %s49_s30 = int_to_ptr.vmem [resolvable:$true] %s48_s30  ;;  %s35_s16 = int_to_ptr.vmem [resolvable:$true] %s34_s16 }
   0x4   :  { %s1294_s17 = scalar_lea.vmem %s49_s30, 1024  ;;  %p1299_p1 = scmp.lt.s32.totalorder %s49_s30, %s49_s30 }
   0x5   :  { %p1295_p0 = scmp.ne.s32.totalorder %s49_s30, %s1294_s17  ;;  %p1300_p2 = scmp.lt.s32.totalorder %s1294_s17, %s1294_s17 }
   0x7   :  { %p1301_p3 = por %p1300_p2, %p1299_p1 }
   0x9   :  { %p1302_p4 = pnand %p1301_p3, %p1295_p0 }
   0xb   :  { %1305 = shalt.err (!%p1302_p4)
}
   0xc   :  { %s1374_s18 = smov 64   ;;  %s1375_s19 = smov 4  }
   0xd   :  { %54 = dma.hbm_to_vmem [thread:$0]  %s1654_s5, 1024, %s49_s30, [#allocation5], %s1374_s18, %s1374_s18, %s1375_s19  }
   0xe   :  { %s1314_s22 = scalar_lea.vmem %s35_s16, 1024  ;;  %p1319_p6 = scmp.lt.s32.totalorder %s35_s16, %s35_s16 }
   0xf   :  { %p1315_p5 = scmp.ne.s32.totalorder %s35_s16, %s1314_s22  ;;  %p1320_p7 = scmp.lt.s32.totalorder %s1314_s22, %s1314_s22 }
  0x11   :  { %p1321_p8 = por %p1320_p7, %p1319_p6 }
  0x13   :  { %p1322_p9 = pnand %p1321_p8, %p1315_p5 }
  0x15   :  { %1325 = shalt.err (!%p1322_p9)
}
  0x16   :  { %40 = dma.hbm_to_vmem [thread:$0]  %s1652_s3, 1024, %s35_s16, [#allocation3], %s1374_s18, %s1374_s18, %s1375_s19  }
  0x17   :  { %s1376_s25 = smov [#allocation6]   ;;  %s1377_s27 = smov [#allocation7]  }
  0x18   :  { %s62_s26 = sshll.u32 %s1376_s25, 4  ;;  %s76_s28 = sshll.u32 %s1377_s27, 4  ;;  %s63_s26 = int_to_ptr.vmem [resolvable:$true] %s62_s26  ;;  %s77_s28 = int_to_ptr.vmem [resolvable:$true] %s76_s28 }
  0x19   :  { %s1334_s5 = scalar_lea.vmem %s63_s26, 1024  ;;  %p1339_p11 = scmp.lt.s32.totalorder %s63_s26, %s63_s26 }
  0x1a   :  { %p1335_p10 = scmp.ne.s32.totalorder %s63_s26, %s1334_s5  ;;  %p1340_p12 = scmp.lt.s32.totalorder %s1334_s5, %s1334_s5 }
  0x1c   :  { %p1341_p13 = por %p1340_p12, %p1339_p11 }
  0x1e   :  { %p1342_p0 = pnand %p1341_p13, %p1335_p10 }
  0x20   :  { %1345 = shalt.err (!%p1342_p0)
}
  0x21   :  { %68 = dma.hbm_to_vmem [thread:$0]  %s1656_s7, 1024, %s63_s26, [#allocation5], %s1374_s18, %s1374_s18, %s1375_s19  }
  0x22   :  { %s1354_s3 = scalar_lea.vmem %s77_s28, 1024  ;;  %p1359_p2 = scmp.lt.s32.totalorder %s77_s28, %s77_s28 }
  0x23   :  { %p1355_p1 = scmp.ne.s32.totalorder %s77_s28, %s1354_s3  ;;  %p1360_p3 = scmp.lt.s32.totalorder %s1354_s3, %s1354_s3 }
  0x25   :  { %p1361_p4 = por %p1360_p3, %p1359_p2 }
  0x27   :  { %p1362_p5 = pnand %p1361_p4, %p1355_p1 }
  0x29   :  { %1365 = shalt.err (!%p1362_p5)
}
  0x2a   :  { %82 = dma.hbm_to_vmem [thread:$0]  %s1658_s9, 1024, %s77_s28, [#allocation8], %s1374_s18, %s1374_s18, %s1375_s19  }
  0x2b   :  { %1366 = dma.done.wait [#allocation3], 1024  }
  0x2c   :  { %1367 = vsyncadd [#allocation3], 4294966272 }
  0x2d   :  { %1368 = dma.done.wait [#allocation5], 2048  }
  0x2e   :  { %1369 = vsyncadd [#allocation5], 4294965248 }
  0x2f   :  { %1370 = dma.done.wait [#allocation8], 1024  }
  0x30   :  { %1371 = vsyncadd [#allocation8], 4294966272  ;;  %v1378_v0 = vmov 0.0   ;;  %v1195_v1 = vld [vmem:[%s1650_s1 + $0x78] sm:$0xff]   ;;  %v1197_v3 = vld [vmem:[%s1650_s1 + $0x70] sm:$0xff]   ;;  %vm1379_vm0 = vmmov 0  }
  0x31   :  { %1106 = vmatprep.subr.bf16.mxu1 %v1378_v0  ;;  %v1196_v2 = vld [vmem:[%s1650_s1 + $0x38] sm:$0xff]   ;;  %1048 = vmatprep.subr.bf16.mxu0 %v1195_v1  ;;  %v1198_v4 = vld [vmem:[%s1650_s1 + $0x30] sm:$0xff]   ;;  %v1199_v5 = vld [vmem:[%s1650_s1 + $0x68] sm:$0xff]  }
  0x32   :  { %1049 = vmatpush3.bf16.msra.mxu0 %v1196_v2  ;;  %v1200_v6 = vld [vmem:[%s1650_s1 + $0x28] sm:$0xff]   ;;  %v1201_v7 = vld [vmem:[%s1650_s1 + $0x60] sm:$0xff]   ;;  %v1203_v9 = vld [vmem:[%s1650_s1 + $0x58] sm:$0xff]   ;;  %1122 = vmatprep.mubr.msk.bf16.mxu1 %vm1379_vm0, %v1378_v0 }
  0x33   :  { %1050 = vmatprep.subr.bf16.mxu0 %v1197_v3  ;;  %v1202_v8 = vld [vmem:[%s1650_s1 + $0x20] sm:$0xff]   ;;  %v1204_v10 = vld [vmem:[%s1650_s1 + $0x18] sm:$0xff]   ;;  %v1205_v11 = vld [vmem:[%s1650_s1 + $0x50] sm:$0xff]  }
  0x34   :  { %v1206_v12 = vld [vmem:[%s1650_s1 + $0x10] sm:$0xff]   ;;  %v1213_v13 = vld [vmem:[%s1649_s0 + $0x4] ss:$8 sps:$4 sm:$0xff]   ;;  %v1214_v14 = vld [vmem:[#allocation2 + $0x38] sm:$0xff]  }
  0x35   :  { %v1207_v15 = vld [vmem:[%s1650_s1 + $0x48] sm:$0xff]   ;;  %281 = vmatprep.mubr.bf16.mxu0 %v1213_v13  ;;  %1107 = vmatpush3.bf16.msra.mxu1 %v1214_v14  ;;  %v1215_v16 = vld [vmem:[#allocation2 + $0x30] sm:$0xff]   ;;  %v1209_v18 = vld [vmem:[%s1650_s1 + $0x40] sm:$0xff]  }
  0x36   :  { %1051 = vmatpush3.bf16.msra.mxu0 %v1198_v4  ;;  %v1208_v17 = vld [vmem:[%s1650_s1 + $0x8] sm:$0xff]   ;;  %1108 = vmatprep.subr.bf16.mxu1 %v1378_v0  ;;  %v1210_v20 = vld [vmem:[%s1650_s1] sm:$0xff]   ;;  %v1218_v23 = vld [vmem:[#allocation2 + $0x18] sm:$0xff]  }
  0x37   :  { %1052 = vmatprep.subr.bf16.mxu0 %v1199_v5  ;;  %v1216_v19 = vld [vmem:[#allocation2 + $0x28] sm:$0xff]   ;;  %v1217_v21 = vld [vmem:[#allocation2 + $0x20] sm:$0xff]   ;;  %v1219_v24 = vld [vmem:[#allocation2 + $0x10] sm:$0xff]  }
  0x38   :  { %v1211_v22 = vld [vmem:[%s1649_s0] ss:$8 sps:$4 sm:$0xff]   ;;  %v1222_v27 = vld [vmem:[#allocation4 + $0x38] sm:$0xff]   ;;  %v1223_v28 = vld [vmem:[#allocation4 + $0x30] sm:$0xff]  }
  0x39   :  { %1109 = vmatpush3.bf16.msra.mxu1 %v1215_v16  ;;  %v1220_v25 = vld [vmem:[#allocation2 + $0x8] sm:$0xff]   ;;  %v1221_v26 = vld [vmem:[#allocation2] sm:$0xff]   ;;  %v1226_v31 = vld [vmem:[#allocation4 + $0x18] sm:$0xff]  }
  0x3a   :  { %1053 = vmatpush3.bf16.msra.mxu0 %v1200_v6  ;;  %1110 = vmatprep.subr.bf16.mxu1 %v1378_v0  ;;  %v1224_v29 = vld [vmem:[#allocation4 + $0x28] sm:$0xff]   ;;  %v1225_v30 = vld [vmem:[#allocation4 + $0x20] sm:$0xff]   ;;  %v1227_v44 = vld [vmem:[#allocation4 + $0x10] sm:$0xff]  }
  0x3b   :  { %1054 = vmatprep.subr.bf16.mxu0 %v1201_v7  ;;  %v960_v35 = vld [vmem:[%s1651_s2] ss:$0 sm:$0xff]  ;;  %v1228_v45 = vld [vmem:[#allocation4 + $0x8] sm:$0xff]   ;;  %v1230_v47 = vld [vmem:[#allocation6 + $0x38] sm:$0xff]  }
  0x3c   :  { %v1229_v46 = vld [vmem:[#allocation4] sm:$0xff]   ;;  %v1231_v48 = vld [vmem:[#allocation6 + $0x30] sm:$0xff]   ;;  %v1232_v49 = vld [vmem:[#allocation6 + $0x28] sm:$0xff]  }
  0x3d   :  { %1111 = vmatpush3.bf16.msra.mxu1 %v1216_v19  ;;  %v1233_v50 = vld [vmem:[#allocation6 + $0x20] sm:$0xff]   ;;  %v1234_v51 = vld [vmem:[#allocation6 + $0x18] sm:$0xff]   ;;  %v1235_v52 = vld [vmem:[#allocation6 + $0x10] sm:$0xff]  }
  0x3e   :  { %1055 = vmatpush3.bf16.msra.mxu0 %v1202_v8  ;;  %1112 = vmatprep.subr.bf16.mxu1 %v1378_v0  ;;  %v979_v53 = vld [vmem:[%s1653_s4] ss:$0 sm:$0xff]  ;;  %v1236_v63 = vld [vmem:[#allocation6 + $0x8] sm:$0xff]   ;;  %v1238_v2 = vld [vmem:[#allocation7 + $0x38] sm:$0xff]  }
  0x3f   :  { %1056 = vmatprep.subr.bf16.mxu0 %v1203_v9  ;;  %v1237_v1 = vld [vmem:[#allocation6] sm:$0xff]   ;;  %v1239_v3 = vld [vmem:[#allocation7 + $0x30] sm:$0xff]   ;;  %v1240_v4 = vld [vmem:[#allocation7 + $0x28] sm:$0xff]  }
  0x40   :  { %v1241_v5 = vld [vmem:[#allocation7 + $0x20] sm:$0xff]   ;;  %v1242_v6 = vld [vmem:[#allocation7 + $0x18] sm:$0xff]   ;;  %v1244_v16 = vld [vmem:[#allocation7 + $0x8] sm:$0xff]  }
  0x41   :  { %1113 = vmatpush3.bf16.msra.mxu1 %v1217_v21  ;;  %v988_v8 = vld [vmem:[%s1655_s6] ss:$0 sm:$0xff]  ;;  %v1248_v19 = vld [vmem:[%s1660_s11 + $0x74] ss:$8 sps:$4 sm:$0xff]  }
  0x42   :  { %1057 = vmatpush3.bf16.msra.mxu0 %v1204_v10  ;;  %1114 = vmatprep.subr.bf16.mxu1 %v1378_v0  ;;  %v1254_v21 = vld [vmem:[%s1660_s11 + $0x54] ss:$8 sps:$4 sm:$0xff]  }
  0x43   :  { %1058 = vmatprep.subr.bf16.mxu0 %v1205_v11 }
  0x45   :  { %1115 = vmatpush3.bf16.msra.mxu1 %v1218_v23  ;;  %v1257_v23 = vld [vmem:[%s1660_s11 + $0x44] ss:$8 sps:$4 sm:$0xff]  }
  0x46   :  { %1059 = vmatpush3.bf16.msra.mxu0 %v1206_v12  ;;  %1116 = vmatprep.subr.bf16.mxu1 %v1378_v0 }
  0x47   :  { %1060 = vmatprep.subr.bf16.mxu0 %v1207_v15  ;;  %v1243_v15 = vld [vmem:[#allocation7 + $0x10] sm:$0xff]  }
  0x49   :  { %1117 = vmatpush3.bf16.msra.mxu1 %v1219_v24  ;;  %v1255_v24 = vld [vmem:[%s1660_s11 + $0x40] ss:$8 sps:$4 sm:$0xff]  }
  0x4a   :  { %1061 = vmatpush3.bf16.msra.mxu0 %v1208_v17  ;;  %1118 = vmatprep.subr.bf16.mxu1 %v1378_v0  ;;  %v1245_v17 = vld [vmem:[#allocation7] sm:$0xff]  }
  0x4b   :  { %1062 = vmatprep.subr.bf16.mxu0 %v1209_v18  ;;  %v1246_v18 = vld [vmem:[%s1660_s11 + $0x70] ss:$8 sps:$4 sm:$0xff]  }
  0x4d   :  { %1119 = vmatpush3.bf16.msra.mxu1 %v1220_v25  ;;  %v1260_v25 = vld [vmem:[%s1660_s11 + $0x34] ss:$8 sps:$4 sm:$0xff]  }
  0x4e   :  { %1063 = vmatpush3.bf16.msra.mxu0 %v1210_v20  ;;  %1120 = vmatprep.subr.bf16.mxu1 %v1378_v0  ;;  %v1251_v20 = vld [vmem:[%s1660_s11 + $0x64] ss:$8 sps:$4 sm:$0xff]  }
  0x4f   :  { %1126 = vmatprep.subr.bf16.mxu0 %v1378_v0 }
  0x51   :  { %282 = vmatmul.mubr.bf16.vlgmr.msra.gmra.mxu0 %v1211_v22  ;;  %1121 = vmatpush3.bf16.msra.mxu1 %v1221_v26  ;;  %v1252_v22 = vld [vmem:[%s1660_s11 + $0x50] ss:$8 sps:$4 sm:$0xff]  }
  0x52   :  { %1142 = vmatprep.mubr.msk.bf16.mxu0 %vm1379_vm0, %v1378_v0  ;;  %1146 = vmatprep.subr.bf16.mxu1 %v1378_v0  ;;  %v1258_v26 = vld [vmem:[%s1660_s11 + $0x30] ss:$8 sps:$4 sm:$0xff]  }
  0x53   :  { %1127 = vmatpush3.bf16.msra.mxu0 %v1222_v27  ;;  %v1263_v27 = vld [vmem:[%s1660_s11 + $0x24] ss:$8 sps:$4 sm:$0xff]  }
  0x54   :  { %1128 = vmatprep.subr.bf16.mxu0 %v1378_v0 }
  0x57   :  { %1129 = vmatpush3.bf16.msra.mxu0 %v1223_v28  ;;  %v1261_v28 = vld [vmem:[%s1660_s11 + $0x20] ss:$8 sps:$4 sm:$0xff]  }
  0x58   :  { %1130 = vmatprep.subr.bf16.mxu0 %v1378_v0 }
  0x5b   :  { %1131 = vmatpush3.bf16.msra.mxu0 %v1224_v29  ;;  %v999_v29 = vld [vmem:[%s1657_s8] ss:$0 sm:$0xff] }
  0x5c   :  { %1132 = vmatprep.subr.bf16.mxu0 %v1378_v0 }
  0x5f   :  { %1133 = vmatpush3.bf16.msra.mxu0 %v1225_v30 }
  0x60   :  { %1134 = vmatprep.subr.bf16.mxu0 %v1378_v0 }
  0x63   :  { %1135 = vmatpush3.bf16.msra.mxu0 %v1226_v31 }
  0x64   :  { %1136 = vmatprep.subr.bf16.mxu0 %v1378_v0 }
  0x67   :  { %1137 = vmatpush3.bf16.msra.mxu0 %v1227_v44  ;;  %v1008_v44 = vld [vmem:[%s1659_s10] ss:$0 sm:$0xff] }
  0x68   :  { %1138 = vmatprep.subr.bf16.mxu0 %v1378_v0 }
  0x6b   :  { %1139 = vmatpush3.bf16.msra.mxu0 %v1228_v45 }
  0x6c   :  { %1140 = vmatprep.subr.bf16.mxu0 %v1378_v0 }
  0x6f   :  { %1141 = vmatpush3.bf16.msra.mxu0 %v1229_v46 }
  0x70   :  { %1166 = vmatprep.subr.bf16.mxu0 %v1378_v0 }
 0x111   :  { %v1064_v32 = vpop.f32.mrf.mxu0 }
 0x113   :  { %v1065_v33 = vpop.f32.mrf.mxu0 }
 0x114   :  { %v1066_v34 = vadd.f32 %v1065_v33, %v1064_v32 }
 0x115   :  { %v1067_v36 = vpop.f32.mrf.mxu0 }
 0x116   :  { %v284_v38 = vadd.f32 %v1066_v34, %v960_v35 }
 0x117   :  { %v1068_v37 = vpop.f32.mrf.mxu0 }
 0x118   :  { %v1069_v39 = vadd.f32 %v1068_v37, %v1067_v36  ;;  %v290_v41 = vmax.f32 %v284_v38, 0.0 }
 0x11a   :  { %v287_v40 = vadd.f32 %v1069_v39, %v960_v35  ;;  %v1266_v39 = vld [vmem:[%s1660_s11 + $0x14] ss:$8 sps:$4 sm:$0xff]  }
 0x11c   :  { %v291_v42 = vmax.f32 %v287_v40, 0.0  ;;  %v1264_v40 = vld [vmem:[%s1660_s11 + $0x10] ss:$8 sps:$4 sm:$0xff]  }
 0x11e   :  { %v292_v43 = vpack.c.bf16 %v291_v42, %v290_v41  ;;  %v1269_v41 = vld [vmem:[%s1660_s11 + $0x4] ss:$8 sps:$4 sm:$0xff]   ;;  %v1267_v42 = vld [vmem:[%s1660_s11] ss:$8 sps:$4 sm:$0xff]  }
 0x120   :  { %1123 = vmatmul.mubr.bf16.vlgmr.msra.gmra.mxu1 %v292_v43  ;;  %v1380_v43 = vmov 0  }
 0x121   :  { %1162 = vmatprep.mubr.msk.bf16.mxu1 %vm1379_vm0, %v1378_v0  ;;  %1147 = vmatpush3.bf16.msra.mxu1 %v1230_v47 }
 0x122   :  { %1148 = vmatprep.subr.bf16.mxu1 %v1378_v0 }
 0x125   :  { %1149 = vmatpush3.bf16.msra.mxu1 %v1231_v48 }
 0x126   :  { %1150 = vmatprep.subr.bf16.mxu1 %v1378_v0 }
 0x129   :  { %1151 = vmatpush3.bf16.msra.mxu1 %v1232_v49 }
 0x12a   :  { %1152 = vmatprep.subr.bf16.mxu1 %v1378_v0 }
 0x12d   :  { %1153 = vmatpush3.bf16.msra.mxu1 %v1233_v50 }
 0x12e   :  { %1154 = vmatprep.subr.bf16.mxu1 %v1378_v0 }
 0x131   :  { %1155 = vmatpush3.bf16.msra.mxu1 %v1234_v51 }
 0x132   :  { %1156 = vmatprep.subr.bf16.mxu1 %v1378_v0 }
 0x135   :  { %1157 = vmatpush3.bf16.msra.mxu1 %v1235_v52 }
 0x136   :  { %1158 = vmatprep.subr.bf16.mxu1 %v1378_v0 }
 0x139   :  { %1159 = vmatpush3.bf16.msra.mxu1 %v1236_v63 }
 0x13a   :  { %1160 = vmatprep.subr.bf16.mxu1 %v1378_v0 }
 0x13d   :  { %1161 = vmatpush3.bf16.msra.mxu1 %v1237_v1 }
 0x13e   :  { %868 = vmatprep.subr.bf16.mxu1 %v1248_v19 }
 0x1e0   :  { %v398_v54 = vpop.f32.mrf.mxu1 }
 0x1e1   :  { %v399_v56 = vadd.f32 %v979_v53, %v398_v54  ;;  %v778_v54 = vlaneseq }
 0x1e2   :  { %v1124_v55 = vpop.f32.mrf.mxu1 }
 0x1e3   :  { %v405_v60 = vmax.f32 %v399_v56, 0.0  ;;  %v779_v55 = vshrl.u32 %v778_v54, 7 }
 0x1e4   :  { %v401_v57 = vpop.f32.mrf.mxu1 }
 0x1e5   :  { %v402_v58 = vadd.f32 %v979_v53, %v401_v57  ;;  %v780_v56 = vsub.s32 0, %v779_v55  ;;  %v776_v57 = vld [vmem:[%s1661_s12] sm:$0x3] }
 0x1e6   :  { %v1125_v59 = vpop.f32.mrf.mxu1 }
 0x1e7   :  { %v406_v61 = vmax.f32 %v402_v58, 0.0  ;;  %v784_v58 = vsub.s32 1, %v779_v55  ;;  %v781_v59 = vrot.slane %v776_v57, %v780_v56 }
 0x1e9   :  { %v407_v62 = vpack.c.bf16 %v406_v61, %v405_v60  ;;  %v785_v60 = vrot.slane %v776_v57, %v784_v58 }
 0x1eb   :  { %1143 = vmatmul.mubr.bf16.vlgmr.msra.gmra.mxu0 %v407_v62 }
 0x1ec   :  { %1182 = vmatprep.mubr.msk.bf16.mxu0 %vm1379_vm0, %v1378_v0  ;;  %1167 = vmatpush3.bf16.msra.mxu0 %v1238_v2 }
 0x1ed   :  { %1168 = vmatprep.subr.bf16.mxu0 %v1378_v0 }
 0x1f0   :  { %1169 = vmatpush3.bf16.msra.mxu0 %v1239_v3 }
 0x1f1   :  { %1170 = vmatprep.subr.bf16.mxu0 %v1378_v0 }
 0x1f4   :  { %1171 = vmatpush3.bf16.msra.mxu0 %v1240_v4 }
 0x1f5   :  { %1172 = vmatprep.subr.bf16.mxu0 %v1378_v0 }
 0x1f8   :  { %1173 = vmatpush3.bf16.msra.mxu0 %v1241_v5 }
 0x1f9   :  { %1174 = vmatprep.subr.bf16.mxu0 %v1378_v0 }
 0x1fc   :  { %1175 = vmatpush3.bf16.msra.mxu0 %v1242_v6 }
 0x1fd   :  { %1176 = vmatprep.subr.bf16.mxu0 %v1378_v0 }
 0x200   :  { %1177 = vmatpush3.bf16.msra.mxu0 %v1243_v15 }
 0x201   :  { %1178 = vmatprep.subr.bf16.mxu0 %v1378_v0 }
 0x204   :  { %1179 = vmatpush3.bf16.msra.mxu0 %v1244_v16 }
 0x205   :  { %1180 = vmatprep.subr.bf16.mxu0 %v1378_v0  ;;  %v1249_v0 = vld [vmem:[%s1660_s11 + $0x60] ss:$8 sps:$4 sm:$0xff]  }
 0x208   :  { %1181 = vmatpush3.bf16.msra.mxu0 %v1245_v17 }
 0x2ab   :  { %v513_v7 = vpop.f32.mrf.mxu0 }
 0x2ac   :  { %v514_v11 = vadd.f32 %v988_v8, %v513_v7 }
 0x2ad   :  { %v1144_v9 = vpop.f32.mrf.mxu0 }
 0x2af   :  { %v516_v10 = vpop.f32.mrf.mxu0 }
 0x2b0   :  { %v517_v12 = vadd.f32 %v988_v8, %v516_v10 }
 0x2b1   :  { %v1145_v13 = vpop.f32.mrf.mxu0 }
 0x2b2   :  { %v520_v14 = vpack.c.bf16 %v517_v12, %v514_v11 }
 0x2b4   :  { %1047 = vst [vmem:[%s1663_s14] sm:$0xff] %v520_v14   ;;  %1163 = vmatmul.mubr.bf16.vlgmr.msra.gmra.mxu1 %v520_v14 }
 0x2b5   :  { %869 = vmatpush1.bf16.msra.mxu1 %v1246_v18  ;;  %900 = vmatprep.mubr.bf16.mxu1 %v1380_v43 }
 0x2b6   :  { %870 = vmatprep.subr.bf16.mxu1 %v1251_v20 }
 0x2b9   :  { %871 = vmatpush1.bf16.msra.mxu1 %v1249_v0 }
 0x2ba   :  { %872 = vmatprep.subr.bf16.mxu1 %v1254_v21 }
 0x2bd   :  { %873 = vmatpush1.bf16.msra.mxu1 %v1252_v22 }
 0x2be   :  { %874 = vmatprep.subr.bf16.mxu1 %v1257_v23 }
 0x2c1   :  { %875 = vmatpush1.bf16.msra.mxu1 %v1255_v24 }
 0x2c2   :  { %876 = vmatprep.subr.bf16.mxu1 %v1260_v25 }
 0x2c5   :  { %877 = vmatpush1.bf16.msra.mxu1 %v1258_v26 }
 0x2c6   :  { %878 = vmatprep.subr.bf16.mxu1 %v1263_v27 }
 0x2c9   :  { %879 = vmatpush1.bf16.msra.mxu1 %v1261_v28 }
 0x2ca   :  { %880 = vmatprep.subr.bf16.mxu1 %v1266_v39 }
 0x2cd   :  { %881 = vmatpush1.bf16.msra.mxu1 %v1264_v40 }
 0x2ce   :  { %882 = vmatprep.subr.bf16.mxu1 %v1269_v41 }
 0x2d1   :  { %883 = vmatpush1.bf16.msra.mxu1 %v1267_v42 }
 0x374   :  { %v635_v30 = vpop.f32.mrf.mxu1 }
 0x375   :  { %v636_v32 = vadd.f32 %v999_v29, %v635_v30 }
 0x376   :  { %v1164_v31 = vpop.f32.mrf.mxu1 }
 0x377   :  { %v642_v36 = vmax.f32 %v636_v32, 0.0 }
 0x378   :  { %v638_v33 = vpop.f32.mrf.mxu1 }
 0x379   :  { %v639_v34 = vadd.f32 %v999_v29, %v638_v33 }
 0x37a   :  { %v1165_v35 = vpop.f32.mrf.mxu1 }
 0x37b   :  { %v643_v37 = vmax.f32 %v639_v34, 0.0 }
 0x37d   :  { %v644_v38 = vpack.c.bf16 %v643_v37, %v642_v36 }
 0x37f   :  { %1183 = vmatmul.mubr.bf16.vlgmr.msra.gmra.mxu0 %v644_v38 }
 0x43f   :  { %v750_v45 = vpop.f32.mrf.mxu0 }
 0x440   :  { %v751_v47 = vadd.f32 %v1008_v44, %v750_v45 }
 0x441   :  { %v1184_v46 = vpop.f32.mrf.mxu0 }
 0x442   :  { %v757_v51 = vmax.f32 %v751_v47, 0.0 }
 0x443   :  { %v753_v48 = vpop.f32.mrf.mxu0 }
 0x444   :  { %v754_v49 = vadd.f32 %v1008_v44, %v753_v48 }
 0x445   :  { %v1185_v50 = vpop.f32.mrf.mxu0 }
 0x446   :  { %v758_v52 = vmax.f32 %v754_v49, 0.0 }
 0x448   :  { %v759_v53 = vpack.c.bf16 %v758_v52, %v757_v51 }
 0x44a   :  { %901 = vmatmul.mubr.bf16.vlgmr.msra.gmra.mxu1 %v759_v53 }
 0x50a   :  { %v902_v61 = vpop.f32.mrf.mxu1 }
 0x50b   :  { %v903_v62 = vadd.f32 %v902_v61, %v781_v59 }
 0x50c   :  { %v904_v63 = vpop.f32.mrf.mxu1 }
 0x50d   :  { %v1033_v1 = vmul.f32 -1.442695, %v903_v62  ;;  %v905_v2 = vadd.f32 %v904_v63, %v785_v60 }
 0x50e   :  { %v906_v3 = vpop.f32.mrf.mxu1 }
 0x50f   :  { %1270 = vpow2.f32 %v1033_v1  ;;  %v1034_v4 = vmul.f32 -1.442695, %v905_v2  ;;  %v907_v5 = vadd.f32 %v906_v3, %v781_v59 }
 0x510   :  { %v908_v6 = vpop.f32.mrf.mxu1 }
 0x511   :  { %1272 = vpow2.f32 %v1034_v4  ;;  %v1035_v7 = vmul.f32 -1.442695, %v907_v5  ;;  %v909_v8 = vadd.f32 %v908_v6, %v785_v60 }
 0x513   :  { %1274 = vpow2.f32 %v1035_v7  ;;  %v1036_v9 = vmul.f32 -1.442695, %v909_v8 }
 0x515   :  { %1276 = vpow2.f32 %v1036_v9 }
 0x51c   :  { %v1271_v10 = vpop.eup %1270 }
 0x51d   :  { %v923_v11 = vadd.f32 1.0, %v1271_v10 }
 0x51e   :  { %v1273_v12 = vpop.eup %1272 }
 0x51f   :  { %v924_v13 = vadd.f32 1.0, %v1273_v12  ;;  %1278 = vrcp.f32 %v923_v11 }
 0x520   :  { %v1275_v14 = vpop.eup %1274 }
 0x521   :  { %1280 = vrcp.f32 %v924_v13  ;;  %v925_v15 = vadd.f32 1.0, %v1275_v14 }
 0x522   :  { %v1277_v16 = vpop.eup %1276 }
 0x523   :  { %v926_v17 = vadd.f32 1.0, %v1277_v16  ;;  %1282 = vrcp.f32 %v925_v15 }
 0x525   :  { %1284 = vrcp.f32 %v926_v17 }
 0x52c   :  { %v1279_v18 = vpop.eup %1278 }
 0x52e   :  { %v1281_v19 = vpop.eup %1280 }
 0x52f   :  { %v1041_v20 = vpack.c.bf16 %v1281_v19, %v1279_v18 }
 0x530   :  { %v1283_v0 = vpop.eup %1282 }
 0x531   :  { %947 = vst [vmem:[%s1662_s13] sm:$0xff] %v1041_v20 }
 0x532   :  { %v1285_v21 = vpop.eup %1284 }
 0x533   :  { %v1042_v22 = vpack.c.bf16 %v1285_v21, %v1283_v0 }
 0x535   :  { %948 = vst [vmem:[%s1662_s13 + $0x8] sm:$0xff] %v1042_v22 }
 0x536   :  { %957 = vsyncpa [#allocation3], 1 }
 0x537   :  { %958 = vsyncpa [#allocation5], 1 }
 0x538   :  { %959 = vsyncpa [#allocation8], 1 }

</bundles_post_ra>
